<compile_context>
chip_gen: v7x
topology: tpu7x:2x2x1
jax: 0.10.0
libtpu: 0.0.40
codegen_flags: <defaults>
</compile_context>

<pallas_src>
import functools

import jax
import jax.numpy as jnp
from jax.experimental import pallas as pl
from jax.experimental.pallas import tpu as pltpu


def _cbn_kernel(x_ref, gb_ref, o_ref, *, eps, inv_count):
    # x_ref:  (N, TC, HW)  -- TC channels, spatial flattened onto the lane dim
    # gb_ref: (N, TC, 2)   -- per-(sample, channel) [gamma, beta], f32
    # o_ref:  (N, TC, HW)

    # Pass 1: per-channel mean over (N, HW).  Sum across N first (pure VALU adds),
    # then ONE cross-lane (XLU) reduce per channel row instead of N of them.
    x = x_ref[...].astype(jnp.float32)                                   # (N, TC, HW)
    mean = jnp.sum(jnp.sum(x, axis=0), axis=-1, keepdims=True) * inv_count   # (TC, 1)

    # Pass 2: biased variance via a centered (two-pass) sum of squares — numerically
    # safer than E[x^2]-mean^2; the block is VMEM-resident so this extra VMEM-only
    # pass is hidden under the HBM DMA of the next/previous blocks.
    d = x_ref[...].astype(jnp.float32) - mean                            # (N, TC, HW)
    var = jnp.sum(jnp.sum(d * d, axis=0), axis=-1, keepdims=True) * inv_count  # (TC, 1)
    inv_std = jax.lax.rsqrt(var + eps)                                   # (TC, 1)

    # Fold normalization + conditional affine into one per-element FMA:
    #   out = a * x + c,   a = gamma * inv_std,   c = beta - mean * a
    g = gb_ref[:, :, 0:1]                                                # (N, TC, 1)
    b = gb_ref[:, :, 1:2]                                                # (N, TC, 1)
    a = g * inv_std                                                      # (N, TC, 1)
    c = b - mean * a                                                     # (N, TC, 1)

    # Pass 3: re-read x so the f32 working copies above need not stay live here.
    o_ref[...] = (x_ref[...].astype(jnp.float32) * a + c).astype(o_ref.dtype)


def _pick_channel_tile(N, C, HW, itemsize, *, target_block_bytes=2 * 1024 * 1024,
                       min_grid=4):
    """Channel tile TC.

    Legality: TC divides C and is either a multiple of the sublane pack
    (8 f32 / 16 bf16 / 32 int8) or equal to C, so the (N, TC, HW) BlockSpec is
    layout-legal.  Preference order:
      1. block (plus its in-kernel f32 working copy) fits `target_block_bytes`,
      2. grid = C // TC >= min_grid (DMA overlap + v7x megacore), falling back to
         grid >= 2, then to the largest fitting tile,
      3. largest such TC.
    """
    pack = {1: 32, 2: 16}.get(itemsize, 8)
    packed = [d for d in range(pack, C + 1, pack) if C % d == 0]
    cands = packed if packed else [C]

    f32_copy = 0 if itemsize >= 4 else 4  # bf16/int8 inputs get an f32 working copy

    def block_bytes(tc):
        return N * tc * HW * (itemsize + f32_copy)

    fitting = [d for d in cands if block_bytes(d) <= target_block_bytes]
    if not fitting:
        # Even the smallest legal tile busts the per-block budget; return it and
        # let the caller's VMEM accounting fail loudly if it truly cannot fit.
        return min(cands)
    for g_min in (min_grid, 2):
        good = [d for d in fitting if C // d >= g_min]
        if good:
            return max(good)
    return max(fitting)  # small C: short grid unavoidable, take the biggest tile


def conditional_batch_norm_2d(x, y, embed_weight, *, eps=1e-5):
    """x: (N, C, H, W) NCHW; y: (N,) int class ids; embed_weight: (num_classes, 2C)."""
    N, C, H, W = x.shape
    HW = H * W

    # Glue (plain JAX): embedding lookup, split into gamma/beta, pack as (N, C, 2)
    # in f32 so the kernel pulls a single tiny side block per grid step.
    gb = embed_weight[y].astype(jnp.float32)                  # (N, 2C)
    gb_packed = jnp.stack([gb[:, :C], gb[:, C:]], axis=-1)    # (N, C, 2)

    # Free, contiguous reshape (no transpose, no extra HBM traffic).
    x_flat = x.reshape(N, C, HW)

    # TODO(synk): when HW < 128 (4x4 / 8x8 DCGAN feature maps) the lane dim is
    # under-filled and stores are masked; packing 128 // HW adjacent channels into
    # the lane dim with a segmented reduce would recover store bandwidth.
    itemsize = jnp.dtype(x.dtype).itemsize
    TC = _pick_channel_tile(N, C, HW, itemsize)
    grid = C // TC

    # ---- VMEM budget (explicit, v7x-aware) --------------------------------------
    tc_pad = -(-TC // 8) * 8                       # sublane pad of the f32 gb block
    x_blk_bytes = N * TC * HW * itemsize
    x_f32_bytes = N * TC * HW * 4                  # in-kernel f32 working copy / temp
    gb_blk_bytes = N * tc_pad * 128 * 4            # (N, TC, 2) lane-padded to 128, f32
    vmem_needed = (
        2 * x_blk_bytes          # input block, double-buffered
        + 2 * x_blk_bytes        # output block, double-buffered
        + 2 * gb_blk_bytes       # gamma/beta side block, double-buffered
        + 2 * x_f32_bytes        # f32 cast copy + centered temporary
        + (2 << 20)              # margin for Mosaic-internal scratch
    )
    # v7x has only 64 MiB physical VMEM per TensorCore; stay well under it.  On
    # v5e/v6e this simply overrides the 16/32 MiB scoped default.
    vmem_cap = 48 << 20
    if vmem_needed > vmem_cap:
        # TODO(synk): blocks this large need a two-phase kernel (stats-accumulate
        # over an HW grid axis, then apply); fail loudly instead of thrashing.
        raise ValueError(
            f"ConditionalBatchNorm2d block (N={N}, TC={TC}, HW={HW}) needs "
            f"~{vmem_needed >> 20} MiB VMEM, above the {vmem_cap >> 20} MiB cap."
        )
    vmem_limit = int(max(vmem_needed, 4 << 20))

    inv_count = 1.0 / float(N * HW)

    cost = pl.CostEstimate(
        flops=int(8 * N * C * HW),                       # two reduce passes + FMA
        transcendentals=int(C),                          # one rsqrt per channel
        bytes_accessed=int(2 * N * C * HW * itemsize + N * C * 2 * 4),
    )

    out_flat = pl.pallas_call(
        functools.partial(_cbn_kernel, eps=float(eps), inv_count=inv_count),
        out_shape=jax.ShapeDtypeStruct((N, C, HW), x.dtype),
        grid_spec=pltpu.PrefetchScalarGridSpec(
            num_scalar_prefetch=0,
            grid=(grid,),
            in_specs=[
                pl.BlockSpec((N, TC, HW), lambda c: (0, c, 0)),
                pl.BlockSpec((N, TC, 2), lambda c: (0, c, 0)),
            ],
            out_specs=pl.BlockSpec((N, TC, HW), lambda c: (0, c, 0)),
        ),
        compiler_params=pltpu.CompilerParams(
            dimension_semantics=("parallel",),
            vmem_limit_bytes=vmem_limit,
        ),
        cost_estimate=cost,
    )(x_flat, gb_packed)

    return out_flat.reshape(N, C, H, W)


def _reference(x, y, embed_weight, eps=1e-5):
    N, C, H, W = x.shape
    mean = jnp.mean(x, axis=(0, 2, 3), keepdims=True)
    var = jnp.mean((x - mean) ** 2, axis=(0, 2, 3), keepdims=True)
    x_hat = (x - mean) * jax.lax.rsqrt(var + eps)
    gb = embed_weight[y]
    gamma = gb[:, :C].reshape(N, C, 1, 1)
    beta = gb[:, C:].reshape(N, C, 1, 1)
    return gamma * x_hat + beta


def _make_inputs(key, N, C, H, W, num_classes):
    kx, ky, kw = jax.random.split(key, 3)
    x = jax.random.normal(kx, (N, C, H, W), dtype=jnp.float32)
    y = jax.random.randint(ky, (N,), 0, num_classes, dtype=jnp.int32)
    # Parameter init mirroring the module: embed.weight[:, :C] ~ N(1, 0.02), rest 0.
    gamma_part = 1.0 + 0.02 * jax.random.normal(kw, (num_classes, C), dtype=jnp.float32)
    beta_part = jnp.zeros((num_classes, C), dtype=jnp.float32)
    embed_weight = jnp.concatenate([gamma_part, beta_part], axis=1)
    return x, y, embed_weight


if __name__ == "__main__":
    key = jax.random.PRNGKey(0)
    k1, k2 = jax.random.split(key)

    # Small shape consistent with the module's forward.
    x, y, w = _make_inputs(k1, N=2, C=4, H=16, W=16, num_classes=10)
    out = jax.block_until_ready(conditional_batch_norm_2d(x, y, w))
    ref = _reference(x, y, w)
    assert out.shape == x.shape
    assert jnp.allclose(out, ref, atol=1e-4, rtol=1e-4), float(jnp.max(jnp.abs(out - ref)))

    # Second small shape that exercises the multi-step channel grid (TC=8, grid=4).
    x2, y2, w2 = _make_inputs(k2, N=2, C=32, H=16, W=16, num_classes=10)
    out2 = jax.block_until_ready(conditional_batch_norm_2d(x2, y2, w2))
    ref2 = _reference(x2, y2, w2)
    assert jnp.allclose(out2, ref2, atol=1e-4, rtol=1e-4), float(jnp.max(jnp.abs(out2 - ref2)))

    print("KERNEL_OK")
</pallas_src>

<mosaic_0001>
module attributes {stable_mosaic.version = 11 : i64} {
  func.func @_cbn_kernel(%arg0: i32, %arg1: memref<2x4x256xf32, #tpu.memory_space<vmem>>, %arg2: memref<2x4x2xf32, #tpu.memory_space<vmem>>, %arg3: memref<2x4x256xf32, #tpu.memory_space<vmem>>) attributes {dimension_semantics = [#tpu.dimension_semantics<parallel>], iteration_bounds = array<i64: 1>, scalar_prefetch = 0 : i64, scratch_operands = 0 : i64, tpu.core_type = #tpu.core_type<tc>, window_params = [{transform_indices = @transform_0, window_bounds = array<i64: 2, 4, 256>}, {transform_indices = @transform_1, window_bounds = array<i64: 2, 4, 2>}, {transform_indices = @transform_2, window_bounds = array<i64: 2, 4, 256>}]} {
    %c0 = arith.constant 0 : index
    %c0_0 = arith.constant 0 : index
    %c0_1 = arith.constant 0 : index
    %0 = vector.load %arg1[%c0, %c0_0, %c0_1] : memref<2x4x256xf32, #tpu.memory_space<vmem>>, vector<2x4x256xf32>
    %cst = arith.constant dense<0.000000e+00> : vector<4x256xf32>
    %1 = vector.multi_reduction <add>, %0, %cst [0] : vector<2x4x256xf32> to vector<4x256xf32>
    %cst_2 = arith.constant dense<0.000000e+00> : vector<4xf32>
    %2 = vector.multi_reduction <add>, %1, %cst_2 [1] : vector<4x256xf32> to vector<4xf32>
    %3 = vector.shape_cast %2 : vector<4xf32> to vector<4x1xf32>
    %cst_3 = arith.constant 0.001953125 : f32
    %4 = vector.broadcast %cst_3 : f32 to vector<4x1xf32>
    %5 = arith.mulf %3, %4 : vector<4x1xf32>
    %c0_4 = arith.constant 0 : index
    %c0_5 = arith.constant 0 : index
    %c0_6 = arith.constant 0 : index
    %6 = vector.load %arg1[%c0_4, %c0_5, %c0_6] : memref<2x4x256xf32, #tpu.memory_space<vmem>>, vector<2x4x256xf32>
    %7 = vector.shape_cast %5 : vector<4x1xf32> to vector<1x4x1xf32>
    %8 = vector.broadcast %7 : vector<1x4x1xf32> to vector<2x4x256xf32>
    %9 = arith.subf %6, %8 : vector<2x4x256xf32>
    %10 = arith.mulf %9, %9 : vector<2x4x256xf32>
    %cst_7 = arith.constant dense<0.000000e+00> : vector<4x256xf32>
    %11 = vector.multi_reduction <add>, %10, %cst_7 [0] : vector<2x4x256xf32> to vector<4x256xf32>
    %cst_8 = arith.constant dense<0.000000e+00> : vector<4xf32>
    %12 = vector.multi_reduction <add>, %11, %cst_8 [1] : vector<4x256xf32> to vector<4xf32>
    %13 = vector.shape_cast %12 : vector<4xf32> to vector<4x1xf32>
    %cst_9 = arith.constant 0.001953125 : f32
    %14 = vector.broadcast %cst_9 : f32 to vector<4x1xf32>
    %15 = arith.mulf %13, %14 : vector<4x1xf32>
    %cst_10 = arith.constant 9.99999974E-6 : f32
    %16 = vector.broadcast %cst_10 : f32 to vector<4x1xf32>
    %17 = arith.addf %15, %16 : vector<4x1xf32>
    %18 = math.rsqrt %17 : vector<4x1xf32>
    %c0_11 = arith.constant 0 : index
    %c0_12 = arith.constant 0 : index
    %c0_13 = arith.constant 0 : index
    %19 = vector.load %arg2[%c0_11, %c0_12, %c0_13] : memref<2x4x2xf32, #tpu.memory_space<vmem>>, vector<2x4x1xf32>
    %c0_14 = arith.constant 0 : index
    %c0_15 = arith.constant 0 : index
    %c1 = arith.constant 1 : index
    %20 = vector.load %arg2[%c0_14, %c0_15, %c1] : memref<2x4x2xf32, #tpu.memory_space<vmem>>, vector<2x4x1xf32>
    %21 = vector.shape_cast %18 : vector<4x1xf32> to vector<1x4x1xf32>
    %22 = vector.broadcast %21 : vector<1x4x1xf32> to vector<2x4x1xf32>
    %23 = arith.mulf %19, %22 : vector<2x4x1xf32>
    %24 = vector.shape_cast %5 : vector<4x1xf32> to vector<1x4x1xf32>
    %25 = vector.broadcast %24 : vector<1x4x1xf32> to vector<2x4x1xf32>
    %26 = arith.mulf %25, %23 : vector<2x4x1xf32>
    %27 = arith.subf %20, %26 : vector<2x4x1xf32>
    %c0_16 = arith.constant 0 : index
    %c0_17 = arith.constant 0 : index
    %c0_18 = arith.constant 0 : index
    %28 = vector.load %arg1[%c0_16, %c0_17, %c0_18] : memref<2x4x256xf32, #tpu.memory_space<vmem>>, vector<2x4x256xf32>
    %29 = vector.broadcast %23 : vector<2x4x1xf32> to vector<2x4x256xf32>
    %30 = arith.mulf %28, %29 : vector<2x4x256xf32>
    %31 = vector.broadcast %27 : vector<2x4x1xf32> to vector<2x4x256xf32>
    %32 = arith.addf %30, %31 : vector<2x4x256xf32>
    %c0_19 = arith.constant 0 : index
    %c0_20 = arith.constant 0 : index
    %c0_21 = arith.constant 0 : index
    %33 = vector.load %arg3[%c0_19, %c0_20, %c0_21] : memref<2x4x256xf32, #tpu.memory_space<vmem>>, vector<2x4x256xf32>
    tpu.vector_store %arg3[%c0_19, %c0_20, %c0_21], %32 {strides = array<i32>} : memref<2x4x256xf32, #tpu.memory_space<vmem>>, vector<2x4x256xf32>,
    return
  }
  func.func @transform_0(%arg0: i32) -> (i32, i32, i32) {
    %c0_i32 = arith.constant 0 : i32
    %c0_i32_0 = arith.constant 0 : i32
    %c0_i32_1 = arith.constant 0 : i32
    return %c0_i32, %arg0, %c0_i32_0 : i32, i32, i32
  }
  func.func @transform_1(%arg0: i32) -> (i32, i32, i32) {
    %c0_i32 = arith.constant 0 : i32
    %c0_i32_0 = arith.constant 0 : i32
    %c0_i32_1 = arith.constant 0 : i32
    return %c0_i32, %arg0, %c0_i32_0 : i32, i32, i32
  }
  func.func @transform_2(%arg0: i32) -> (i32, i32, i32) {
    %c0_i32 = arith.constant 0 : i32
    %c0_i32_0 = arith.constant 0 : i32
    %c0_i32_1 = arith.constant 0 : i32
    return %c0_i32, %arg0, %c0_i32_0 : i32, i32, i32
  }
}

</mosaic_0001>

<bundles_post_ra>
// kernel: tpu_custom_call.1
= control target key start
LH: loop header
LB: loop body
LE: loop exit
PB: predicated region body
PF: predicated region fallthrough
CT: control target
= control target key end

     0   :  { %7 = vsyncpa [#allocation3], 0  ;;  %s323_s0 = inlined_call_operand.hbm [shape: f32[2,4,256], index: 0, kind: input, shape index: {}]   ;;  %s324_s1 = inlined_call_operand.vmem [shape: f32[2,4,2], index: 1, kind: input, shape index: {}]   ;;  %s325_s2 = inlined_call_operand.hbm [shape: f32[2,4,256], index: 2, kind: output, shape index: {}]  }
   0x1   :  { %8 = vsyncpa [#allocation4], 0  ;;  %s231_s9 = smov [#allocation2]   ;;  %s183_s13 = scalar_lea.hbm %s323_s0, 256 }
   0x2   :  { %s14_s10 = sshll.u32 %s231_s9, 4  ;;  %p184_p0 = scmp.ne.s32.totalorder %s323_s0, %s183_s13  ;;  %s15_s10 = int_to_ptr.vmem [resolvable:$true] %s14_s10 }
   0x3   :  { %p187_p1 = scmp.lt.u32.totalorder %s183_s13, %s323_s0 }
   0x5   :  { %p189_p2 = pnand %p187_p1, %p184_p0 }
   0x7   :  { %192 = shalt.err (!%p189_p2)
}
   0x8   :  { %s193_s18 = scalar_lea.vmem %s15_s10, 256  ;;  %p198_p4 = scmp.lt.s32.totalorder %s15_s10, %s15_s10 }
   0x9   :  { %p194_p3 = scmp.ne.s32.totalorder %s15_s10, %s193_s18  ;;  %p199_p5 = scmp.lt.s32.totalorder %s193_s18, %s193_s18 }
   0xb   :  { %p200_p6 = por %p199_p5, %p198_p4 }
   0xd   :  { %p201_p7 = pnand %p200_p6, %p194_p3 }
   0xf   :  { %204 = shalt.err (!%p201_p7)
}
  0x10   :  { %s232_s19 = smov 128   ;;  %s233_s20 = smov 8  }
  0x11   :  { %20 = dma.hbm_to_vmem [thread:$0]  %s323_s0, 256, %s15_s10, [#allocation3], %s232_s19, %s232_s19, %s233_s20  }
  0x12   :  { %227 = dma.done.wait [#allocation3], 256  }
  0x13   :  { %228 = vsyncadd [#allocation3], 4294967040  ;;  %vm34_vm0 = vcmask 1043456   ;;  %v269_v0 = vld [vmem:[#allocation2] sm:$0xff]  ;;  %v271_v1 = vld [vmem:[#allocation2 + $0x8] sm:$0xff]  ;;  %v51_v15 = vlaneseq  ;;  %v235_v37 = vmov 0  }
  0x14   :  { %v30_v2 = vcombine.high %v269_v0, %v269_v0  ;;  %v31_v3 = vcombine.high %v271_v1, %v271_v1  ;;  %v35_v4 = vsel %vm34_vm0, %v269_v0, 0.0  ;;  %v36_v5 = vsel %vm34_vm0, %v271_v1, 0.0  ;;  %175 = vset.pattern.permute.xlu0 %v235_v37  ;;  %176 = vset.pattern.permute.xlu1 %v235_v37  ;;  %v80_v41 = vld [vmem:[%s324_s1] sm:$0xf]  ;;  %v81_v43 = vld [vmem:[%s324_s1 + $0x4] sm:$0xf] }
  0x15   :  { %v37_v6 = vadd.f32 %v36_v5, %v35_v4  ;;  %v234_v13 = vmov 839922192   ;;  %v52_v17 = vshrl.u32 %v51_v15, 7  ;;  %s236_s26 = smov 1   ;;  %v237_v48 = vmov 1   ;;  %s238_s1 = smov [#allocation5]  }
  0x16   :  { %v38_v7 = vsel %vm34_vm0, %v30_v2, 0.0  ;;  %v39_v8 = vsel %vm34_vm0, %v31_v3, 0.0  ;;  %v49_v14 = vunpack.c.l.s4 %v234_v13  ;;  %s155_s27 = sshll.u32 %s238_s1, 4  ;;  %s156_s27 = int_to_ptr.vmem [resolvable:$true] %s155_s27 }
  0x17   :  { %v40_v9 = vadd.f32 %v39_v8, %v38_v7  ;;  %v41_v10 = vsel %vm34_vm0, %v37_v6, 0.0  ;;  %s205_s28 = scalar_lea.vmem %s156_s27, 256  ;;  %p210_p9 = scmp.lt.s32.totalorder %s156_s27, %s156_s27 }
  0x18   :  { %v50_v16 = vunpack.c.0.s8 %v49_v14  ;;  %p206_p8 = scmp.ne.s32.totalorder %s156_s27, %s205_s28  ;;  %p211_p10 = scmp.lt.s32.totalorder %s205_s28, %s205_s28 }
  0x19   :  { %v42_v11 = vsel %vm34_vm0, %v40_v9, 0.0 }
  0x1a   :  { %v43_v12 = vadd.f32 %v42_v11, %v41_v10  ;;  %v285_v18 = vsub.s32 %v50_v16, %v52_v17  ;;  %p212_p11 = por %p211_p10, %p210_p9 }
  0x1c   :  { %44 = vadd.xlane.f32.xlu0 %v43_v12  ;;  %p213_p12 = pnand %p212_p11, %p206_p8 }
  0xa9   :  { %v45_v19 = vpop.xlane.xlu0 %44 }
  0xaa   :  { %v46_v20 = vmul.f32 0.001953125, %v45_v19 }
  0xac   :  { %v54_v21 = vrot.slane %v46_v20, %v285_v18 }
  0xae   :  { %v56_v22 = vsub.f32 %v269_v0, %v54_v21  ;;  %v57_v23 = vsub.f32 %v271_v1, %v54_v21 }
  0xb0   :  { %v58_v24 = vmul.f32 %v56_v22, %v56_v22  ;;  %v59_v25 = vmul.f32 %v57_v23, %v57_v23 }
  0xb2   :  { %v62_v26 = vcombine.high %v58_v24, %v58_v24  ;;  %v63_v27 = vcombine.high %v59_v25, %v59_v25  ;;  %v66_v28 = vsel %vm34_vm0, %v58_v24, 0.0  ;;  %v67_v29 = vsel %vm34_vm0, %v59_v25, 0.0 }
  0xb3   :  { %v68_v30 = vadd.f32 %v67_v29, %v66_v28 }
  0xb4   :  { %v69_v31 = vsel %vm34_vm0, %v62_v26, 0.0  ;;  %v70_v32 = vsel %vm34_vm0, %v63_v27, 0.0 }
  0xb5   :  { %v71_v33 = vadd.f32 %v70_v32, %v69_v31  ;;  %v72_v34 = vsel %vm34_vm0, %v68_v30, 0.0 }
  0xb7   :  { %v73_v35 = vsel %vm34_vm0, %v71_v33, 0.0 }
  0xb8   :  { %v74_v36 = vadd.f32 %v73_v35, %v72_v34 }
  0xba   :  { %75 = vadd.xlane.f32.xlu0 %v74_v36 }
 0x147   :  { %v76_v38 = vpop.xlane.xlu0 %75 }
 0x148   :  { %v77_v39 = vmul.f32 0.001953125, %v76_v38 }
 0x14a   :  { %v78_v40 = vadd.f32 1e-05, %v77_v39 }
 0x14c   :  { %181 = vrsqrt.f32 %v78_v40 }
 0x156   :  { %v182_v42 = vpop.eup %181 }
 0x157   :  { %v82_v44 = vmul.f32 %v182_v42, %v80_v41  ;;  %v83_v46 = vmul.f32 %v182_v42, %v81_v43 }
 0x159   :  { %98 = vperm.xlu0 %175, %v82_v44   ;;  %v84_v45 = vmul.f32 %v82_v44, %v46_v20  ;;  %v85_v47 = vmul.f32 %v83_v46, %v46_v20 }
 0x15b   :  { %88 = vrot.lane.b32.xlu1 %v84_v45, %s236_s26 }
 0x15d   :  { %178 = vset.pattern.permute.xlu0 %v237_v48 }
 0x15f   :  { %90 = vrot.lane.b32.xlu1 %v85_v47, %s236_s26 }
 0x163   :  { %102 = vperm.xlu1 %176, %v83_v46  }
 0x167   :  { %177 = vset.pattern.permute.xlu1 %v237_v48 }
 0x1cd   :  { %v89_v49 = vpop.permute.xlu1 %88 }
 0x1ce   :  { %v94_v50 = vsub.f32 %v80_v41, %v89_v49 }
 0x1d0   :  { %124 = vperm.xlu1 %177, %v94_v50  }
 0x1d1   :  { %v91_v51 = vpop.permute.xlu1 %90 }
 0x1d2   :  { %v95_v52 = vsub.f32 %v81_v43, %v91_v51 }
 0x1d4   :  { %128 = vperm.xlu1 %177, %v95_v52  }
 0x1d8   :  { %v99_v53 = vpop.permute.xlu0 %98 }
 0x1d9   :  { %v110_v55 = vrot.slane %v99_v53, %v285_v18 }
 0x1db   :  { %v120_v57 = vmul.f32 %v110_v55, %v269_v0 }
 0x1e2   :  { %v103_v54 = vpop.permute.xlu1 %102 }
 0x1e3   :  { %v117_v58 = vrot.slane %v103_v54, %v285_v18 }
 0x1e5   :  { %v121_v62 = vmul.f32 %v117_v58, %v271_v1 }
 0x24f   :  { %v125_v56 = vpop.permute.xlu1 %124 }
 0x250   :  { %v136_v59 = vrot.slane %v125_v56, %v285_v18 }
 0x252   :  { %v146_v60 = vadd.f32 %v136_v59, %v120_v57 }
 0x253   :  { %v129_v61 = vpop.permute.xlu1 %128 }
 0x254   :  { %148 = vst [vmem:[#allocation5] sm:$0xff] %v146_v60  ;;  %v143_v63 = vrot.slane %v129_v61, %v285_v18 }
 0x256   :  { %v147_v2 = vadd.f32 %v143_v63, %v121_v62 }
 0x258   :  { %149 = vst [vmem:[#allocation5 + $0x8] sm:$0xff] %v147_v2 }
 0x259   :  { %216 = shalt.err (!%p213_p12)
}
 0x25a   :  { %s217_s3 = scalar_lea.hbm %s325_s2, 256 }
 0x25b   :  { %p218_p13 = scmp.ne.s32.totalorder %s325_s2, %s217_s3  ;;  %p221_p0 = scmp.lt.u32.totalorder %s217_s3, %s325_s2 }
 0x25d   :  { %p223_p1 = pnand %p221_p0, %p218_p13 }
 0x25f   :  { %226 = shalt.err (!%p223_p1)
}
 0x260   :  { %161 = dma.vmem_to_hbm [thread:$0]  %s156_s27, 256, %s325_s2, [#allocation4], %s232_s19, %s232_s19, %s233_s20  }
 0x261   :  { %229 = dma.done.wait [#allocation4], 256  }
 0x262   :  { %230 = vsyncadd [#allocation4], 4294967040 }
 0x263   :  { %165 = vsyncpa [#allocation3], 1 }
 0x264   :  { %166 = vsyncpa [#allocation4], 1 }

</bundles_post_ra>
